<compile_context>
chip_gen: v6e
topology: v6e:2x2x1
jax: 0.10.0
libtpu: 0.0.40
codegen_flags: <defaults>
</compile_context>

<pallas_src>
import functools

import jax
import jax.numpy as jnp
from jax.experimental import pallas as pl
from jax.experimental.pallas import tpu as pltpu

_NEG_SLOPE = 0.01
_SIGMA_MIN = 1e-6
_SIGMA_MAX = 1.0


def _leaky_relu(x, slope=_NEG_SLOPE):
    return jnp.where(x >= 0, x, slope * x)


def actor_fwd_kernel(state_ref,
                     w1_ref, b1_ref,
                     w2_ref, b2_ref,
                     whead_ref, bhead_ref,
                     out_ref,
                     *, n_actions):
    # state: f32 [TB, D_in]; weights: bf16; biases: f32.
    x = state_ref[...]

    # fc1 + leaky_relu  (bf16 MXU operands, f32 accumulation, f32 VPU epilogue)
    h1 = jnp.dot(x.astype(jnp.bfloat16), w1_ref[...],
                 preferred_element_type=jnp.float32)
    h1 = _leaky_relu(h1 + b1_ref[...])                      # [TB, FC1] f32

    # fc2 + leaky_relu
    h2 = jnp.dot(h1.astype(jnp.bfloat16), w2_ref[...],
                 preferred_element_type=jnp.float32)
    h2 = _leaky_relu(h2 + b2_ref[...])                      # [TB, FC2] f32

    # fused heads: columns [0, A) = mu, [A, 2A) = sigma  (no lane padding)
    heads = jnp.dot(h2.astype(jnp.bfloat16), whead_ref[...],
                    preferred_element_type=jnp.float32)
    heads = heads + bhead_ref[...]                          # [TB, 2A] f32

    # clamp only the sigma lanes to [1e-6, 1]
    lane = jax.lax.broadcasted_iota(jnp.int32, heads.shape, 1)
    out_ref[...] = jnp.where(lane >= n_actions,
                             jnp.clip(heads, _SIGMA_MIN, _SIGMA_MAX),
                             heads)


def prepare_params(raw):
    """One-time param prep (keep the result as persistent device arrays; do NOT
    re-derive per environment step): fuse the mu/sigma heads along the output
    axis and cast the matmul weights to bf16. Biases stay f32."""
    return dict(
        w1=raw["w1"].astype(jnp.bfloat16),                                  # [D_in, FC1]
        b1=raw["b1"].astype(jnp.float32),                                   # [1, FC1]
        w2=raw["w2"].astype(jnp.bfloat16),                                  # [FC1, FC2]
        b2=raw["b2"].astype(jnp.float32),                                   # [1, FC2]
        whead=jnp.concatenate([raw["wmu"], raw["ws"]], axis=1).astype(jnp.bfloat16),  # [FC2, 2A]
        bhead=jnp.concatenate([raw["bmu"], raw["bs"]], axis=1).astype(jnp.float32),   # [1, 2A]
    )


def actor_forward(state, prep, *, batch_tile=256):
    """state: [B, D_in] f32; prep: output of prepare_params().

    Returns (mu, sigma), both [B, n_actions] float32.
    batch_tile should be a multiple of 8 (256 fills the v6e/v7x MXU M dim;
    128 suffices on v5e)."""
    B, d_in = state.shape
    head_w = prep["whead"].shape[1]
    n_actions = head_w // 2
    fc1 = prep["w1"].shape[1]
    fc2 = prep["w2"].shape[1]

    kernel = functools.partial(actor_fwd_kernel, n_actions=n_actions)

    cost = pl.CostEstimate(
        flops=2 * B * (d_in * fc1 + fc1 * fc2 + fc2 * head_w),
        transcendentals=0,
        bytes_accessed=(state.size * 4 + B * head_w * 4
                        + (prep["w1"].size + prep["w2"].size + prep["whead"].size) * 2
                        + (prep["b1"].size + prep["b2"].size + prep["bhead"].size) * 4),
    )

    args = (state, prep["w1"], prep["b1"], prep["w2"], prep["b2"],
            prep["whead"], prep["bhead"])

    if B <= batch_tile:
        # Small batch: no grid, everything VMEM-resident in one shot
        # (total residency << VMEM on every generation; a grid would only add
        #  per-step pipeline overhead).
        vmem = pl.BlockSpec(memory_space=pltpu.MemorySpace.VMEM)
        out = pl.pallas_call(
            kernel,
            out_shape=jax.ShapeDtypeStruct((B, head_w), jnp.float32),
            in_specs=[vmem] * 7,
            out_specs=vmem,
            cost_estimate=cost,
        )(*args)
    else:
        # Large rollout batches: tile the batch so VMEM stays bounded and the
        # state load / output writeback pipeline against the MXU; weights use a
        # constant index_map so they are fetched once and stay resident.
        tb = batch_tile
        n_tiles = pl.cdiv(B, tb)
        b_pad = n_tiles * tb
        state_p = state if b_pad == B else jnp.pad(state, ((0, b_pad - B), (0, 0)))
        const = lambda i: (0, 0)
        out = pl.pallas_call(
            kernel,
            out_shape=jax.ShapeDtypeStruct((b_pad, head_w), jnp.float32),
            grid=(n_tiles,),
            in_specs=[
                pl.BlockSpec((tb, d_in), lambda i: (i, 0)),   # state: tiled on batch
                pl.BlockSpec((d_in, fc1), const),             # weights/biases: resident
                pl.BlockSpec((1, fc1), const),
                pl.BlockSpec((fc1, fc2), const),
                pl.BlockSpec((1, fc2), const),
                pl.BlockSpec((fc2, head_w), const),
                pl.BlockSpec((1, head_w), const),
            ],
            out_specs=pl.BlockSpec((tb, head_w), lambda i: (i, 0)),
            compiler_params=pltpu.CompilerParams(
                dimension_semantics=("parallel",)),            # v7x: 2 TCs split the batch
            cost_estimate=cost,
        )(state_p, *args[1:])
        out = out[:B]

    mu = out[:, :n_actions]
    sigma = out[:, n_actions:]
    return mu, sigma


def init_params(key, input_dim, fc1_dims, fc2_dims, n_actions):
    """Deterministic synthetic init (PyTorch-Linear-like uniform fan-in).

    Weights stored as [in_features, out_features] (transposed vs. nn.Linear)."""
    def linear(k, fan_in, fan_out):
        kw, kb = jax.random.split(k)
        bound = 1.0 / jnp.sqrt(fan_in)
        w = jax.random.uniform(kw, (fan_in, fan_out), jnp.float32, -bound, bound)
        b = jax.random.uniform(kb, (1, fan_out), jnp.float32, -bound, bound)
        return w, b

    k1, k2, k3, k4 = jax.random.split(key, 4)
    w1, b1 = linear(k1, input_dim, fc1_dims)
    w2, b2 = linear(k2, fc1_dims, fc2_dims)
    wmu, bmu = linear(k3, fc2_dims, n_actions)
    ws, bs = linear(k4, fc2_dims, n_actions)
    return dict(w1=w1, b1=b1, w2=w2, b2=b2, wmu=wmu, bmu=bmu, ws=ws, bs=bs)


def reference_forward_bf16(state, prep, n_actions):
    """Plain-JAX reference with the kernel's exact numerics (bf16 operands,
    f32 accumulation) — tight-tolerance correctness check."""
    h1 = _leaky_relu(jnp.dot(state.astype(jnp.bfloat16), prep["w1"],
                             preferred_element_type=jnp.float32) + prep["b1"])
    h2 = _leaky_relu(jnp.dot(h1.astype(jnp.bfloat16), prep["w2"],
                             preferred_element_type=jnp.float32) + prep["b2"])
    heads = jnp.dot(h2.astype(jnp.bfloat16), prep["whead"],
                    preferred_element_type=jnp.float32) + prep["bhead"]
    mu = heads[:, :n_actions]
    sigma = jnp.clip(heads[:, n_actions:], _SIGMA_MIN, _SIGMA_MAX)
    return mu, sigma


def reference_forward_f32(state, p):
    """Full-precision reference (loose-tolerance sanity check vs. bf16 weights)."""
    h1 = _leaky_relu(state @ p["w1"] + p["b1"])
    h2 = _leaky_relu(h1 @ p["w2"] + p["b2"])
    mu = h2 @ p["wmu"] + p["bmu"]
    sigma = jnp.clip(h2 @ p["ws"] + p["bs"], _SIGMA_MIN, _SIGMA_MAX)
    return mu, sigma


if __name__ == "__main__":
    # Shapes consistent with the module: input_dims=(8,), fc=256, n_actions=2.
    B, D_IN, FC1, FC2, N_ACT = 8, 8, 256, 256, 2

    key = jax.random.PRNGKey(0)
    k_state, k_params, k_big = jax.random.split(key, 3)

    state = jax.random.normal(k_state, (B, D_IN), dtype=jnp.float32)
    raw = init_params(k_params, D_IN, FC1, FC2, N_ACT)
    prep = prepare_params(raw)   # one-time: fuse heads + bf16 weight cast

    # ---- small batch: no-grid path ----
    mu, sigma = actor_forward(state, prep)
    mu, sigma = jax.block_until_ready((mu, sigma))

    mu_ref, sigma_ref = reference_forward_bf16(state, prep, N_ACT)
    mu_f32, sigma_f32 = reference_forward_f32(state, raw)
    assert mu.shape == (B, N_ACT) and sigma.shape == (B, N_ACT)
    assert jnp.allclose(mu, mu_ref, atol=1e-3, rtol=1e-3)
    assert jnp.allclose(sigma, sigma_ref, atol=1e-3, rtol=1e-3)
    assert jnp.allclose(mu, mu_f32, atol=5e-2, rtol=5e-2)       # bf16 weight drift
    assert jnp.allclose(sigma, sigma_f32, atol=5e-2, rtol=5e-2)
    assert jnp.all(sigma >= _SIGMA_MIN) and jnp.all(sigma <= _SIGMA_MAX)

    # ---- large rollout batch: batch-grid path (incl. tail padding) ----
    BIG = 384  # not a multiple of the 256 batch tile -> exercises padding
    big_state = jax.random.normal(k_big, (BIG, D_IN), dtype=jnp.float32)
    mu_b, sigma_b = actor_forward(big_state, prep, batch_tile=256)
    mu_b, sigma_b = jax.block_until_ready((mu_b, sigma_b))

    mu_br, sigma_br = reference_forward_bf16(big_state, prep, N_ACT)
    assert mu_b.shape == (BIG, N_ACT) and sigma_b.shape == (BIG, N_ACT)
    assert jnp.allclose(mu_b, mu_br, atol=1e-3, rtol=1e-3)
    assert jnp.allclose(sigma_b, sigma_br, atol=1e-3, rtol=1e-3)
    assert jnp.all(sigma_b >= _SIGMA_MIN) and jnp.all(sigma_b <= _SIGMA_MAX)

    # TODO(synk): sample_normal (Normal rsample + tanh squash + log_prob) relies
    # on torch.distributions sampling; only forward() is implemented in-kernel.

    print("KERNEL_OK")
</pallas_src>

<mosaic_0001>
module attributes {stable_mosaic.version = 11 : i64} {
  func.func @actor_fwd_kernel(%arg0: memref<8x8xf32, #tpu.memory_space<vmem>>, %arg1: memref<8x256xbf16, #tpu.memory_space<vmem>>, %arg2: memref<1x256xf32, #tpu.memory_space<vmem>>, %arg3: memref<256x256xbf16, #tpu.memory_space<vmem>>, %arg4: memref<1x256xf32, #tpu.memory_space<vmem>>, %arg5: memref<256x4xbf16, #tpu.memory_space<vmem>>, %arg6: memref<1x4xf32, #tpu.memory_space<vmem>>, %arg7: memref<8x4xf32, #tpu.memory_space<vmem>>) attributes {dimension_semantics = [], scalar_prefetch = 0 : i64, scratch_operands = 0 : i64, tpu.core_type = #tpu.core_type<tc>} {
    %c0 = arith.constant 0 : index
    %c0_0 = arith.constant 0 : index
    %0 = vector.load %arg0[%c0, %c0_0] : memref<8x8xf32, #tpu.memory_space<vmem>>, vector<8x8xf32>
    %1 = arith.truncf %0 : vector<8x8xf32> to vector<8x8xbf16>
    %c0_1 = arith.constant 0 : index
    %c0_2 = arith.constant 0 : index
    %2 = vector.load %arg1[%c0_1, %c0_2] : memref<8x256xbf16, #tpu.memory_space<vmem>>, vector<8x256xbf16>
    %cst = arith.constant dense<0.000000e+00> : vector<8x256xf32>
    %3 = tpu.matmul %1, %2, %cst {dimension_numbers = #tpu.dot_dimension_numbers<[1], [0], [0], [1], [0, 0, 1, 1], [], []>} : vector<8x8xbf16>, vector<8x256xbf16>, vector<8x256xf32> -> vector<8x256xf32>
    %c0_3 = arith.constant 0 : index
    %c0_4 = arith.constant 0 : index
    %4 = vector.load %arg2[%c0_3, %c0_4] : memref<1x256xf32, #tpu.memory_space<vmem>>, vector<1x256xf32>
    %5 = vector.broadcast %4 : vector<1x256xf32> to vector<8x256xf32>
    %6 = arith.addf %3, %5 : vector<8x256xf32>
    %cst_5 = arith.constant 0.000000e+00 : f32
    %7 = vector.broadcast %cst_5 : f32 to vector<8x256xf32>
    %8 = arith.cmpf oge, %6, %7 : vector<8x256xf32>
    %cst_6 = arith.constant 0.00999999977 : f32
    %9 = vector.broadcast %cst_6 : f32 to vector<8x256xf32>
    %10 = arith.mulf %9, %6 : vector<8x256xf32>
    %11 = arith.select %8, %6, %10 : vector<8x256xi1>, vector<8x256xf32>
    %12 = arith.truncf %11 : vector<8x256xf32> to vector<8x256xbf16>
    %c0_7 = arith.constant 0 : index
    %c0_8 = arith.constant 0 : index
    %13 = vector.load %arg3[%c0_7, %c0_8] : memref<256x256xbf16, #tpu.memory_space<vmem>>, vector<256x256xbf16>
    %cst_9 = arith.constant dense<0.000000e+00> : vector<8x256xf32>
    %14 = tpu.matmul %12, %13, %cst_9 {dimension_numbers = #tpu.dot_dimension_numbers<[1], [0], [0], [1], [0, 0, 1, 1], [], []>} : vector<8x256xbf16>, vector<256x256xbf16>, vector<8x256xf32> -> vector<8x256xf32>
    %c0_10 = arith.constant 0 : index
    %c0_11 = arith.constant 0 : index
    %15 = vector.load %arg4[%c0_10, %c0_11] : memref<1x256xf32, #tpu.memory_space<vmem>>, vector<1x256xf32>
    %16 = vector.broadcast %15 : vector<1x256xf32> to vector<8x256xf32>
    %17 = arith.addf %14, %16 : vector<8x256xf32>
    %cst_12 = arith.constant 0.000000e+00 : f32
    %18 = vector.broadcast %cst_12 : f32 to vector<8x256xf32>
    %19 = arith.cmpf oge, %17, %18 : vector<8x256xf32>
    %cst_13 = arith.constant 0.00999999977 : f32
    %20 = vector.broadcast %cst_13 : f32 to vector<8x256xf32>
    %21 = arith.mulf %20, %17 : vector<8x256xf32>
    %22 = arith.select %19, %17, %21 : vector<8x256xi1>, vector<8x256xf32>
    %23 = arith.truncf %22 : vector<8x256xf32> to vector<8x256xbf16>
    %c0_14 = arith.constant 0 : index
    %c0_15 = arith.constant 0 : index
    %24 = vector.load %arg5[%c0_14, %c0_15] : memref<256x4xbf16, #tpu.memory_space<vmem>>, vector<256x4xbf16>
    %cst_16 = arith.constant dense<0.000000e+00> : vector<8x4xf32>
    %25 = tpu.matmul %23, %24, %cst_16 {dimension_numbers = #tpu.dot_dimension_numbers<[1], [0], [0], [1], [0, 0, 1, 1], [], []>} : vector<8x256xbf16>, vector<256x4xbf16>, vector<8x4xf32> -> vector<8x4xf32>
    %c0_17 = arith.constant 0 : index
    %c0_18 = arith.constant 0 : index
    %26 = vector.load %arg6[%c0_17, %c0_18] : memref<1x4xf32, #tpu.memory_space<vmem>>, vector<1x4xf32>
    %27 = vector.broadcast %26 : vector<1x4xf32> to vector<8x4xf32>
    %28 = arith.addf %25, %27 : vector<8x4xf32>
    %29 = tpu.iota {dimensions = array<i32: 1>} : vector<8x4xi32>
    %c2_i32 = arith.constant 2 : i32
    %30 = vector.broadcast %c2_i32 : i32 to vector<8x4xi32>
    %31 = arith.cmpi sge, %29, %30 : vector<8x4xi32>
    %cst_19 = arith.constant 9.99999997E-7 : f32
    %cst_20 = arith.constant 1.000000e+00 : f32
    %32 = vector.broadcast %cst_19 : f32 to vector<8x4xf32>
    %33 = arith.maximumf %32, %28 : vector<8x4xf32>
    %34 = vector.broadcast %cst_20 : f32 to vector<8x4xf32>
    %35 = arith.minimumf %34, %33 : vector<8x4xf32>
    %36 = arith.select %31, %35, %28 : vector<8x4xi1>, vector<8x4xf32>
    %c0_21 = arith.constant 0 : index
    %c0_22 = arith.constant 0 : index
    %37 = vector.load %arg7[%c0_21, %c0_22] : memref<8x4xf32, #tpu.memory_space<vmem>>, vector<8x4xf32>
    tpu.vector_store %arg7[%c0_21, %c0_22], %36 {strides = array<i32>} : memref<8x4xf32, #tpu.memory_space<vmem>>, vector<8x4xf32>,
    return
  }
}

</mosaic_0001>

<bundles_post_ra>
// kernel: tpu_custom_call.1
= control target key start
LH: loop header
LB: loop body
LE: loop exit
PB: predicated region body
PF: predicated region fallthrough
CT: control target
= control target key end

     0   :  { %12 = vsyncpa [#allocation3], 0  ;;  %s729_s24 = smov [#allocation2]   ;;  %s842_s0 = inlined_call_operand.vmem [shape: f32[8,8], index: 0, kind: input, shape index: {}]   ;;  %s843_s1 = inlined_call_operand.vmem [shape: bf16[8,256], index: 1, kind: input, shape index: {}]   ;;  %s844_s2 = inlined_call_operand.vmem [shape: f32[1,256], index: 2, kind: input, shape index: {}]   ;;  %s845_s3 = inlined_call_operand.hbm [shape: bf16[256,256], index: 3, kind: input, shape index: {}]   ;;  %s846_s4 = inlined_call_operand.vmem [shape: f32[1,256], index: 4, kind: input, shape index: {}]   ;;  %s847_s5 = inlined_call_operand.vmem [shape: bf16[256,4], index: 5, kind: input, shape index: {}]   ;;  %s848_s6 = inlined_call_operand.vmem [shape: f32[1,4], index: 6, kind: input, shape index: {}]   ;;  %s849_s7 = inlined_call_operand.vmem [shape: f32[8,4], index: 7, kind: output, shape index: {}]  }
   0x1   :  { %s24_s25 = sshll.u32 %s729_s24, 4  ;;  %s25_s25 = int_to_ptr.vmem [resolvable:$true] %s24_s25 }
   0x2   :  { %s715_s26 = scalar_lea.vmem %s25_s25, 4096  ;;  %p720_p1 = scmp.lt.s32.totalorder %s25_s25, %s25_s25 }
   0x3   :  { %p716_p0 = scmp.ne.s32.totalorder %s25_s25, %s715_s26  ;;  %p721_p2 = scmp.lt.s32.totalorder %s715_s26, %s715_s26 }
   0x5   :  { %p722_p3 = por %p721_p2, %p720_p1 }
   0x7   :  { %p723_p4 = pnand %p722_p3, %p716_p0 }
   0x9   :  { %726 = shalt.err (!%p723_p4)
}
   0xa   :  { %s730_s27 = smov 128   ;;  %s731_s28 = smov 8  }
   0xb   :  { %30 = dma.hbm_to_vmem [thread:$0]  %s845_s3, 4096, %s25_s25, [#allocation3], %s730_s27, %s730_s27, %s731_s28  }
   0xc   :  { %727 = dma.done.wait [#allocation3], 4096  }
   0xd   :  { %728 = vsyncadd [#allocation3], 4294963200  ;;  %v732_v0 = vmov 0   ;;  %v43_v1 = vld [vmem:[%s843_s1] sm:$0xff]  ;;  %vm65_vm0 = vcmask 1043456   ;;  %vm61_vm1 = vcmask 64512   ;;  %v46_v50 = vlaneseq }
   0xe   :  { %104 = vmatprep.mubr.bf16.mxu0 %v732_v0  ;;  %v41_v2 = vld [vmem:[%s842_s0] sm:$0xff]  ;;  %v563_v3 = vcombine.high %v43_v1, %v43_v1  ;;  %v562_v4 = vcombine.low %v43_v1, %v43_v1  ;;  %v643_v5 = vld [vmem:[#allocation2 + $0x74] ss:$8 sps:$4 sm:$0xff]   ;;  %v645_v6 = vld [vmem:[#allocation2 + $0x70] ss:$8 sps:$4 sm:$0xff]   ;;  %vm555_vm7 = vcmask 31744  }
   0xf   :  { %v646_v7 = vld [vmem:[#allocation2 + $0x64] ss:$8 sps:$4 sm:$0xff]   ;;  %v42_v9 = vpack.c.bf16 %v41_v2, %v41_v2  ;;  %325 = vmatprep.subr.bf16.mxu1 %v643_v5  ;;  %v648_v10 = vld [vmem:[#allocation2 + $0x60] ss:$8 sps:$4 sm:$0xff]   ;;  %v649_v11 = vld [vmem:[#allocation2 + $0x54] ss:$8 sps:$4 sm:$0xff]  }
  0x10   :  { %564 = vmatprep.subr.msk.bf16.mxu0 %vm65_vm0, %v563_v3  ;;  %v67_v8 = vsel %vm65_vm0, %v562_v4, 0  ;;  %326 = vmatpush1.bf16.msra.mxu1 %v645_v6  ;;  %v651_v12 = vld [vmem:[#allocation2 + $0x50] ss:$8 sps:$4 sm:$0xff]   ;;  %v652_v13 = vld [vmem:[#allocation2 + $0x44] ss:$8 sps:$4 sm:$0xff]   ;;  %v47_v51 = vshrl.u32 %v46_v50, 7 }
  0x11   :  { %87 = vmatpush1.bf16.msra.mxu0 %v67_v8  ;;  %327 = vmatprep.subr.bf16.mxu1 %v646_v7  ;;  %v654_v14 = vld [vmem:[#allocation2 + $0x40] ss:$8 sps:$4 sm:$0xff]   ;;  %v655_v15 = vld [vmem:[#allocation2 + $0x34] ss:$8 sps:$4 sm:$0xff]   ;;  %v657_v16 = vld [vmem:[#allocation2 + $0x30] ss:$8 sps:$4 sm:$0xff]  }
  0x12   :  { %v658_v17 = vld [vmem:[#allocation2 + $0x24] ss:$8 sps:$4 sm:$0xff]   ;;  %v660_v18 = vld [vmem:[#allocation2 + $0x20] ss:$8 sps:$4 sm:$0xff]   ;;  %v661_v19 = vld [vmem:[#allocation2 + $0x14] ss:$8 sps:$4 sm:$0xff]  }
  0x13   :  { %v663_v20 = vld [vmem:[#allocation2 + $0x10] ss:$8 sps:$4 sm:$0xff]   ;;  %v664_v21 = vld [vmem:[#allocation2 + $0x4] ss:$8 sps:$4 sm:$0xff]   ;;  %v666_v22 = vld [vmem:[#allocation2] ss:$8 sps:$4 sm:$0xff]  }
  0x14   :  { %565 = vmatmul.mubr.msk.bf16.vlgmr.msra.gmra.mxu0 %vm61_vm1, %v42_v9  ;;  %328 = vmatpush1.bf16.msra.mxu1 %v648_v10  ;;  %v667_v23 = vld [vmem:[#allocation2 + $0xf4] ss:$8 sps:$4 sm:$0xff]   ;;  %v669_v24 = vld [vmem:[#allocation2 + $0xf0] ss:$8 sps:$4 sm:$0xff]   ;;  %v670_v25 = vld [vmem:[#allocation2 + $0xe4] ss:$8 sps:$4 sm:$0xff]  }
  0x15   :  { %329 = vmatprep.subr.bf16.mxu1 %v649_v11  ;;  %v672_v26 = vld [vmem:[#allocation2 + $0xe0] ss:$8 sps:$4 sm:$0xff]   ;;  %v673_v27 = vld [vmem:[#allocation2 + $0xd4] ss:$8 sps:$4 sm:$0xff]   ;;  %v675_v28 = vld [vmem:[#allocation2 + $0xd0] ss:$8 sps:$4 sm:$0xff]  }
  0x16   :  { %v676_v29 = vld [vmem:[#allocation2 + $0xc4] ss:$8 sps:$4 sm:$0xff]   ;;  %v678_v30 = vld [vmem:[#allocation2 + $0xc0] ss:$8 sps:$4 sm:$0xff]   ;;  %v679_v31 = vld [vmem:[#allocation2 + $0xb4] ss:$8 sps:$4 sm:$0xff]  }
  0x17   :  { %v681_v32 = vld [vmem:[#allocation2 + $0xb0] ss:$8 sps:$4 sm:$0xff]   ;;  %v682_v33 = vld [vmem:[#allocation2 + $0xa4] ss:$8 sps:$4 sm:$0xff]   ;;  %v684_v34 = vld [vmem:[#allocation2 + $0xa0] ss:$8 sps:$4 sm:$0xff]  }
  0x18   :  { %330 = vmatpush1.bf16.msra.mxu1 %v651_v12  ;;  %v685_v35 = vld [vmem:[#allocation2 + $0x94] ss:$8 sps:$4 sm:$0xff]   ;;  %v687_v36 = vld [vmem:[#allocation2 + $0x90] ss:$8 sps:$4 sm:$0xff]   ;;  %v688_v37 = vld [vmem:[#allocation2 + $0x84] ss:$8 sps:$4 sm:$0xff]  }
  0x19   :  { %331 = vmatprep.subr.bf16.mxu1 %v652_v13  ;;  %v690_v38 = vld [vmem:[#allocation2 + $0x80] ss:$8 sps:$4 sm:$0xff]   ;;  %v691_v39 = vld [vmem:[%s847_s5 + $0x78] sm:$0xff]   ;;  %v693_v41 = vld [vmem:[%s847_s5 + $0x70] sm:$0xff]   ;;  %v48_v52 = vsub.s32 0, %v47_v51  ;;  %v52_v54 = vsub.s32 1, %v47_v51 }
  0x1a   :  { %v692_v40 = vld [vmem:[%s847_s5 + $0x38] sm:$0xff]   ;;  %615 = vmatprep.subr.bf16.mxu0 %v691_v39  ;;  %v694_v42 = vld [vmem:[%s847_s5 + $0x30] sm:$0xff]   ;;  %v695_v43 = vld [vmem:[%s847_s5 + $0x68] sm:$0xff]  }
  0x1b   :  { %616 = vmatpush3.bf16.msra.mxu0 %v692_v40  ;;  %v696_v44 = vld [vmem:[%s847_s5 + $0x28] sm:$0xff]   ;;  %v697_v45 = vld [vmem:[%s847_s5 + $0x60] sm:$0xff]   ;;  %v699_v47 = vld [vmem:[%s847_s5 + $0x58] sm:$0xff]  }
  0x1c   :  { %332 = vmatpush1.bf16.msra.mxu1 %v654_v14  ;;  %617 = vmatprep.subr.bf16.mxu0 %v693_v41  ;;  %v698_v46 = vld [vmem:[%s847_s5 + $0x20] sm:$0xff]   ;;  %v700_v48 = vld [vmem:[%s847_s5 + $0x18] sm:$0xff]   ;;  %v701_v49 = vld [vmem:[%s847_s5 + $0x50] sm:$0xff]  }
  0x1d   :  { %333 = vmatprep.subr.bf16.mxu1 %v655_v15  ;;  %v44_v53 = vld [vmem:[%s844_s2] sm:$0x3]  ;;  %v702_v5 = vld [vmem:[%s847_s5 + $0x10] sm:$0xff]   ;;  %v703_v6 = vld [vmem:[%s847_s5 + $0x48] sm:$0xff]  }
  0x1e   :  { %v49_v55 = vrot.slane %v44_v53, %v48_v52  ;;  %v53_v56 = vrot.slane %v44_v53, %v52_v54  ;;  %v704_v7 = vld [vmem:[%s847_s5 + $0x8] sm:$0xff]   ;;  %v705_v8 = vld [vmem:[%s847_s5 + $0x40] sm:$0xff]  }
  0x1f   :  { %618 = vmatpush3.bf16.msra.mxu0 %v694_v42  ;;  %v706_v9 = vld [vmem:[%s847_s5] sm:$0xff]  }
  0x20   :  { %334 = vmatpush1.bf16.msra.mxu1 %v657_v16  ;;  %619 = vmatprep.subr.bf16.mxu0 %v695_v43  ;;  %v153_v10 = vld [vmem:[%s846_s4] sm:$0x3] }
  0x21   :  { %335 = vmatprep.subr.bf16.mxu1 %v658_v17  ;;  %v158_v11 = vrot.slane %v153_v10, %v48_v52  ;;  %v162_v12 = vrot.slane %v153_v10, %v52_v54 }
  0x23   :  { %620 = vmatpush3.bf16.msra.mxu0 %v696_v44 }
  0x24   :  { %336 = vmatpush1.bf16.msra.mxu1 %v660_v18  ;;  %621 = vmatprep.subr.bf16.mxu0 %v697_v45 }
  0x25   :  { %337 = vmatprep.subr.bf16.mxu1 %v661_v19 }
  0x27   :  { %622 = vmatpush3.bf16.msra.mxu0 %v698_v46 }
  0x28   :  { %338 = vmatpush1.bf16.msra.mxu1 %v663_v20  ;;  %623 = vmatprep.subr.bf16.mxu0 %v699_v47 }
  0x29   :  { %339 = vmatprep.subr.bf16.mxu1 %v664_v21 }
  0x2b   :  { %624 = vmatpush3.bf16.msra.mxu0 %v700_v48 }
  0x2c   :  { %340 = vmatpush1.bf16.msra.mxu1 %v666_v22  ;;  %625 = vmatprep.subr.bf16.mxu0 %v701_v49 }
  0x2d   :  { %341 = vmatprep.subr.bf16.mxu1 %v667_v23 }
  0x2f   :  { %626 = vmatpush3.bf16.msra.mxu0 %v702_v5 }
  0x30   :  { %342 = vmatpush2.bf16.msra.mxu1 %v669_v24  ;;  %627 = vmatprep.subr.bf16.mxu0 %v703_v6 }
  0x31   :  { %343 = vmatprep.subr.bf16.mxu1 %v670_v25 }
  0x33   :  { %628 = vmatpush3.bf16.msra.mxu0 %v704_v7 }
  0x34   :  { %344 = vmatpush2.bf16.msra.mxu1 %v672_v26  ;;  %629 = vmatprep.subr.bf16.mxu0 %v705_v8  ;;  %v598_v26 = vld [vmem:[%s848_s6] ss:$0 sm:$0xff] }
  0x35   :  { %345 = vmatprep.subr.bf16.mxu1 %v673_v27 }
  0x37   :  { %630 = vmatpush3.bf16.msra.mxu0 %v706_v9 }
  0x38   :  { %346 = vmatpush2.bf16.msra.mxu1 %v675_v28 }
  0x39   :  { %347 = vmatprep.subr.bf16.mxu1 %v676_v29  ;;  %v550_v29 = vand.u32 127, %v46_v50 }
  0x3b   :  { %vm551_vm6 = vcmp.ge.s32.totalorder %v550_v29, 2 }
  0x3c   :  { %348 = vmatpush2.bf16.msra.mxu1 %v678_v30 }
  0x3d   :  { %349 = vmatprep.subr.bf16.mxu1 %v679_v31 }
  0x40   :  { %350 = vmatpush2.bf16.msra.mxu1 %v681_v32 }
  0x41   :  { %351 = vmatprep.subr.bf16.mxu1 %v682_v33 }
  0x44   :  { %352 = vmatpush2.bf16.msra.mxu1 %v684_v34 }
  0x45   :  { %353 = vmatprep.subr.bf16.mxu1 %v685_v35 }
  0x48   :  { %354 = vmatpush2.bf16.msra.mxu1 %v687_v36 }
  0x49   :  { %355 = vmatprep.subr.bf16.mxu1 %v688_v37 }
  0x4c   :  { %356 = vmatpush2.bf16.msra.mxu1 %v690_v38 }
  0xd4   :  { %v106_v57 = vpop.f32.mrf.mxu0 }
  0xd5   :  { %v107_v58 = vadd.f32 %v106_v57, %v49_v55 }
  0xd6   :  { %v108_v59 = vpop.f32.mrf.mxu0 }
  0xd7   :  { %vm113_vm2 = vcmp.ge.f32.partialorder %v107_v58, 0.0  ;;  %v115_v60 = vmul.f32 0.01, %v107_v58  ;;  %v109_v61 = vadd.f32 %v108_v59, %v53_v56 }
  0xd8   :  { %v110_v62 = vpop.f32.mrf.mxu0 }
  0xd9   :  { %vm114_vm3 = vcmp.ge.f32.partialorder %v109_v61, 0.0  ;;  %v116_v63 = vmul.f32 0.01, %v109_v61  ;;  %v117_v1 = vsel %vm113_vm2, %v107_v58, %v115_v60 }
  0xda   :  { %v111_v0 = vpop.f32.mrf.mxu0  ;;  %v119_v4 = vpack.c.bf16 %v117_v1, %v117_v1 }
  0xdb   :  { %v118_v2 = vsel %vm114_vm3, %v109_v61, %v116_v63 }
  0xdc   :  { %v120_v3 = vpack.c.bf16 %v118_v2, %v118_v2 }
  0xde   :  { %357 = vmatprep.mubr.bf16.mxu1 %v120_v3 }
  0xdf   :  { %358 = vmatmul.mubr.bf16.vlgmr.msra.gmra.mxu1 %v119_v4 }
 0x19f   :  { %v359_v13 = vpop.f32.mrf.mxu1 }
 0x1a0   :  { %v360_v14 = vadd.f32 %v359_v13, %v158_v11 }
 0x1a1   :  { %v361_v15 = vpop.f32.mrf.mxu1 }
 0x1a2   :  { %vm366_vm4 = vcmp.ge.f32.partialorder %v360_v14, 0.0  ;;  %v368_v16 = vmul.f32 0.01, %v360_v14  ;;  %v362_v17 = vadd.f32 %v361_v15, %v162_v12 }
 0x1a3   :  { %v363_v18 = vpop.f32.mrf.mxu1 }
 0x1a4   :  { %vm367_vm5 = vcmp.ge.f32.partialorder %v362_v17, 0.0  ;;  %v369_v19 = vmul.f32 0.01, %v362_v17  ;;  %v370_v20 = vsel %vm366_vm4, %v360_v14, %v368_v16 }
 0x1a5   :  { %v364_v21 = vpop.f32.mrf.mxu1  ;;  %v372_v24 = vpack.c.bf16 %v370_v20, %v370_v20 }
 0x1a6   :  { %v371_v22 = vsel %vm367_vm5, %v362_v17, %v369_v19 }
 0x1a7   :  { %v373_v23 = vpack.c.bf16 %v371_v22, %v371_v22 }
 0x1a9   :  { %541 = vmatprep.mubr.bf16.mxu0 %v373_v23 }
 0x1aa   :  { %542 = vmatmul.mubr.bf16.vlgmr.msra.gmra.mxu0 %v372_v24 }
 0x26a   :  { %v631_v25 = vpop.f32.mrf.mxu0 }
 0x26c   :  { %v632_v27 = vpop.f32.mrf.mxu0 }
 0x26d   :  { %v633_v28 = vadd.f32 %v632_v27, %v631_v25 }
 0x26e   :  { %v634_v30 = vpop.f32.mrf.mxu0 }
 0x26f   :  { %v544_v31 = vadd.f32 %v633_v28, %v598_v26 }
 0x270   :  { %v635_v32 = vpop.f32.mrf.mxu0 }
 0x271   :  { %v552_v33 = vmax.f32 %v544_v31, 1e-06 }
 0x273   :  { %v553_v34 = vmin.f32 %v552_v33, 1.0 }
 0x275   :  { %v554_v35 = vsel %vm551_vm6, %v553_v34, %v544_v31 }
 0x276   :  { %556 = vst.msk [vmem:[%s849_s7] sm:$0xff] %vm555_vm7, %v554_v35 }
 0x277   :  { %561 = vsyncpa [#allocation3], 1 }

</bundles_post_ra>
